<compile_context>
chip_gen: v7x
topology: tpu7x:2x2x1
jax: 0.10.0
libtpu: 0.0.40
codegen_flags: <defaults>
</compile_context>

<pallas_src>
import functools

import jax
import jax.numpy as jnp
from jax.experimental import pallas as pl
from jax.experimental.pallas import tpu as pltpu
import numpy as np

# Fixed graph topology from the reference script (8 nodes, 36 directed edges;
# ChebConv strips self loops before building the Laplacian).
EDGE_INDEX = np.array(
    [[0, 0, 0, 0, 1, 1, 1, 1, 1, 2, 2, 2, 2, 3, 3, 3, 3, 3,
      4, 4, 4, 4, 5, 5, 5, 5, 5, 6, 6, 6, 6, 7, 7, 7, 7, 7],
     [0, 1, 2, 7, 0, 1, 2, 3, 7, 0, 1, 2, 3, 1, 2, 3, 4, 5,
      3, 4, 5, 6, 3, 4, 5, 6, 7, 4, 5, 6, 7, 0, 1, 5, 6, 7]],
    dtype=np.int32)
N_NODES = 8
N_EDGES = EDGE_INDEX.shape[1]

IN_F, HID1, HID2, OUT_F = 80, 40, 20, 5

GRAPHS_PER_BLOCK = 16                       # 16 graphs * 8 nodes = 128 rows
ROWS_PER_BLOCK = GRAPHS_PER_BLOCK * N_NODES  # 128

# ---- merged x/S slab layout (bf16, [num_blocks*128, 256]) --------------------
X_LANE0 = 0          # x features in lanes 0:80
S_LANE0 = 128        # block-diagonal scaled Laplacian in lanes 128:256
XS_LANES = 256

# ---- weight slab layout (bf16, [PARAM_ROWS, 256]) ----------------------------
# K=0 weight halves at lanes 0:F_out, K=1 halves lane-aligned at 128:128+F_out.
W_HI = 128
W1_ROW = 0           # rows 0:80   : W0_1 (lanes 0:40),  W1_1 (lanes 128:168)
W2_ROW = 80          # rows 80:120 : W0_2 (lanes 0:20),  W1_2 (lanes 128:148)
WFC_ROW = 128        # rows 128:148: Wfc  (lanes 0:5)
PARAM_ROWS = 160
PARAM_LANES = 256

# ---- bias slab (f32, [8, 128]) -----------------------------------------------
BIAS_ROWS = 8        # row 0: b1 (0:40), row 1: b2 (0:20), row 2: bfc (0:5)


def net_kernel(xs_ref, w_ref, b_ref, out_ref, *, graphs_per_block, n_nodes):
    x = xs_ref[:, X_LANE0:X_LANE0 + IN_F]                      # [128, 80]  bf16
    s = xs_ref[:, S_LANE0:S_LANE0 + ROWS_PER_BLOCK]            # [128, 128] bf16

    # --- ChebConv 1 (K=2), fused:  xw = x @ [W0 | 0 | W1];  h1 = xw0 + S@xw1 + b1
    xw = jnp.dot(x, w_ref[W1_ROW:W1_ROW + IN_F, :],
                 preferred_element_type=jnp.float32)           # [128, 256] f32
    sxw1 = jnp.dot(s, xw[:, W_HI:W_HI + HID1].astype(jnp.bfloat16),
                   preferred_element_type=jnp.float32)         # [128, 40]  f32
    b1 = b_ref[0:1, 0:HID1]                                    # [1, 40]    f32
    h1 = jnp.maximum(xw[:, 0:HID1] + sxw1 + b1, 0.0)           # ReLU, f32

    # --- ChebConv 2 (K=2), fused ---
    hw = jnp.dot(h1.astype(jnp.bfloat16), w_ref[W2_ROW:W2_ROW + HID1, :],
                 preferred_element_type=jnp.float32)           # [128, 256] f32
    shw1 = jnp.dot(s, hw[:, W_HI:W_HI + HID2].astype(jnp.bfloat16),
                   preferred_element_type=jnp.float32)         # [128, 20]  f32
    b2 = b_ref[1:2, 0:HID2]                                    # [1, 20]    f32
    h2 = jnp.maximum(hw[:, 0:HID2] + shw1 + b2, 0.0)           # [128, 20]  f32

    # --- global_add_pool: f32 packs 8 rows per sublane tile and n_nodes == 8,
    # so this reshape is layout-preserving (no VMEM relayout copy).
    pooled = jnp.sum(h2.reshape(graphs_per_block, n_nodes, HID2), axis=1)  # [16, 20]

    # dropout(training=False) -> identity
    # TODO(synk): training-mode dropout (Bernoulli mask via pltpu.prng_*) not emitted.

    # --- fc + log_softmax, computed over a 128-lane-padded logits row.
    # Weight/bias lanes >= OUT_F are zero; mask them out of the softmax reduction.
    logits = jnp.dot(pooled.astype(jnp.bfloat16), w_ref[WFC_ROW:WFC_ROW + HID2, 0:128],
                     preferred_element_type=jnp.float32) + b_ref[2:3, :]   # [16, 128]
    lane = jax.lax.broadcasted_iota(jnp.int32, logits.shape, 1)
    valid = lane < OUT_F
    masked = jnp.where(valid, logits, jnp.full_like(logits, -1e30))
    m = jnp.max(masked, axis=-1, keepdims=True)
    z = logits - m
    ez = jnp.where(valid, jnp.exp(z), 0.0)
    lse = jnp.log(jnp.sum(ez, axis=-1, keepdims=True))
    out_ref[...] = z - lse          # lanes 0:5 valid; full-width unmasked store


@functools.partial(jax.jit, static_argnames=("num_blocks",))
def net_forward(xs_slab, w_slab, b_slab, num_blocks):
    kernel = functools.partial(net_kernel,
                               graphs_per_block=GRAPHS_PER_BLOCK,
                               n_nodes=N_NODES)
    return pl.pallas_call(
        kernel,
        out_shape=jax.ShapeDtypeStruct((num_blocks * GRAPHS_PER_BLOCK, 128),
                                       jnp.float32),
        grid_spec=pltpu.PrefetchScalarGridSpec(
            num_scalar_prefetch=0,
            grid=(num_blocks,),
            in_specs=[
                pl.BlockSpec((ROWS_PER_BLOCK, XS_LANES), lambda i: (i, 0)),
                pl.BlockSpec((PARAM_ROWS, PARAM_LANES), lambda i: (0, 0)),
                pl.BlockSpec((BIAS_ROWS, 128), lambda i: (0, 0)),
            ],
            out_specs=pl.BlockSpec((GRAPHS_PER_BLOCK, 128), lambda i: (i, 0)),
        ),
        compiler_params=pltpu.CompilerParams(
            dimension_semantics=("parallel",)),
    )(xs_slab, w_slab, b_slab)


def build_scaled_laplacian(edge_index, edge_weight, num_nodes):
    """ChebConv K=2 propagation matrix (lambda_max=2 default, sym norm).

    Matches PyG ChebConv: deg scattered on edge_index[0] (source),
    S[dst, src] = -deg^{-1/2}[src] * w * deg^{-1/2}[dst], self-loops removed.
    """
    src = jnp.asarray(edge_index[0])
    dst = jnp.asarray(edge_index[1])
    w = jnp.asarray(edge_weight, jnp.float32)
    mask = (src != dst).astype(jnp.float32)        # remove_self_loops
    w = w * mask
    deg = jnp.zeros((num_nodes,), jnp.float32).at[src].add(w)
    dinv = jnp.where(deg > 0, 1.0 / jnp.sqrt(deg), 0.0)
    norm_w = dinv[src] * w * dinv[dst]
    s = jnp.zeros((num_nodes, num_nodes), jnp.float32).at[dst, src].add(-norm_w)
    return s


def pack_params(params):
    """Pack weights into one lane-aligned bf16 slab + biases into an f32 slab."""
    w = jnp.zeros((PARAM_ROWS, PARAM_LANES), jnp.float32)
    w = w.at[W1_ROW:W1_ROW + IN_F, 0:HID1].set(params["w01"])
    w = w.at[W1_ROW:W1_ROW + IN_F, W_HI:W_HI + HID1].set(params["w11"])
    w = w.at[W2_ROW:W2_ROW + HID1, 0:HID2].set(params["w02"])
    w = w.at[W2_ROW:W2_ROW + HID1, W_HI:W_HI + HID2].set(params["w12"])
    w = w.at[WFC_ROW:WFC_ROW + HID2, 0:OUT_F].set(params["wfc"])
    w_slab = w.astype(jnp.bfloat16)

    b = jnp.zeros((BIAS_ROWS, 128), jnp.float32)
    b = b.at[0, 0:HID1].set(params["b1"].reshape(-1))
    b = b.at[1, 0:HID2].set(params["b2"].reshape(-1))
    b = b.at[2, 0:OUT_F].set(params["bfc"].reshape(-1))
    return w_slab, b


def pack_inputs(x, edge_attr, batch_size):
    """Merge node features and block-diagonal S tiles into one bf16 slab."""
    num_blocks = max(1, -(-batch_size // GRAPHS_PER_BLOCK))   # cdiv
    xs = jnp.zeros((num_blocks * ROWS_PER_BLOCK, XS_LANES), jnp.float32)
    xs = xs.at[0:batch_size * N_NODES, X_LANE0:X_LANE0 + IN_F].set(x)
    for g in range(batch_size):
        blk, loc = divmod(g, GRAPHS_PER_BLOCK)
        r0 = blk * ROWS_PER_BLOCK + loc * N_NODES
        c0 = S_LANE0 + loc * N_NODES
        s_g = build_scaled_laplacian(EDGE_INDEX, edge_attr[g], N_NODES)
        xs = xs.at[r0:r0 + N_NODES, c0:c0 + N_NODES].set(s_g)
    return xs.astype(jnp.bfloat16), num_blocks


def init_params(key):
    ks = jax.random.split(key, 10)

    def mat(k, shape, fan_in):
        return (jax.random.normal(k, shape, jnp.float32) / np.sqrt(fan_in)).astype(jnp.float32)

    # weights stored as [in, out] (pre-transposed vs torch's [out, in])
    return {
        "w01": mat(ks[0], (IN_F, HID1), IN_F),
        "w11": mat(ks[1], (IN_F, HID1), IN_F),
        "b1":  mat(ks[2], (1, HID1), HID1),
        "w02": mat(ks[3], (HID1, HID2), HID1),
        "w12": mat(ks[4], (HID1, HID2), HID1),
        "b2":  mat(ks[5], (1, HID2), HID2),
        "wfc": mat(ks[6], (HID2, OUT_F), HID2),
        "bfc": mat(ks[7], (1, OUT_F), OUT_F),
    }


if __name__ == "__main__":
    key = jax.random.PRNGKey(0)
    k_x, k_w, k_p = jax.random.split(key, 3)

    batch_size = 2                       # two graphs in the batch
    n_total = batch_size * N_NODES       # 16 real node rows

    # node features [B*N, 80]
    x = jax.random.normal(k_x, (n_total, IN_F), jnp.float32)
    # per-graph positive edge weights (data.edge_attr), shape [B, 36]
    edge_attr = jax.random.uniform(k_w, (batch_size, N_EDGES), jnp.float32,
                                   minval=0.1, maxval=1.0)

    params = init_params(k_p)
    w_slab, b_slab = pack_params(params)
    xs_slab, num_blocks = pack_inputs(x, edge_attr, batch_size)

    out_padded = net_forward(xs_slab, w_slab, b_slab, num_blocks)
    out_padded = jax.block_until_ready(out_padded)
    out = np.asarray(out_padded)[:batch_size, :OUT_F]   # strip lane/graph padding

    assert out.shape == (batch_size, OUT_F)
    # each row of log_softmax should (log-)sum to ~0
    assert np.allclose(np.exp(out).sum(axis=1), 1.0, atol=1e-4)
    print("KERNEL_OK")
</pallas_src>

<mosaic_0001>
module attributes {stable_mosaic.version = 11 : i64} {
  func.func @net_kernel(%arg0: i32, %arg1: memref<128x256xbf16, #tpu.memory_space<vmem>>, %arg2: memref<160x256xbf16, #tpu.memory_space<vmem>>, %arg3: memref<8x128xf32, #tpu.memory_space<vmem>>, %arg4: memref<16x128xf32, #tpu.memory_space<vmem>>) attributes {dimension_semantics = [#tpu.dimension_semantics<parallel>], iteration_bounds = array<i64: 1>, scalar_prefetch = 0 : i64, scratch_operands = 0 : i64, tpu.core_type = #tpu.core_type<tc>, window_params = [{transform_indices = @transform_0, window_bounds = array<i64: 128, 256>}, {pipeline_mode = #tpu.pipeline_mode<synchronous>, transform_indices = @transform_1, window_bounds = array<i64: 160, 256>}, {pipeline_mode = #tpu.pipeline_mode<synchronous>, transform_indices = @transform_2, window_bounds = array<i64: 8, 128>}, {transform_indices = @transform_3, window_bounds = array<i64: 16, 128>}]} {
    %c0 = arith.constant 0 : index
    %c0_0 = arith.constant 0 : index
    %0 = vector.load %arg1[%c0, %c0_0] : memref<128x256xbf16, #tpu.memory_space<vmem>>, vector<128x80xbf16>
    %c0_1 = arith.constant 0 : index
    %c128 = arith.constant 128 : index
    %1 = vector.load %arg1[%c0_1, %c128] : memref<128x256xbf16, #tpu.memory_space<vmem>>, vector<128x128xbf16>
    %c0_2 = arith.constant 0 : index
    %c0_3 = arith.constant 0 : index
    %2 = vector.load %arg2[%c0_2, %c0_3] : memref<160x256xbf16, #tpu.memory_space<vmem>>, vector<80x256xbf16>
    %cst = arith.constant dense<0.000000e+00> : vector<128x256xf32>
    %3 = tpu.matmul %0, %2, %cst {dimension_numbers = #tpu.dot_dimension_numbers<[1], [0], [0], [1], [0, 0, 1, 1], [], []>} : vector<128x80xbf16>, vector<80x256xbf16>, vector<128x256xf32> -> vector<128x256xf32>
    %4 = vector.extract_strided_slice %3 {offsets = [0, 128], sizes = [128, 40], strides = [1, 1]} : vector<128x256xf32> to vector<128x40xf32>
    %5 = arith.truncf %4 : vector<128x40xf32> to vector<128x40xbf16>
    %cst_4 = arith.constant dense<0.000000e+00> : vector<128x40xf32>
    %6 = tpu.matmul %1, %5, %cst_4 {dimension_numbers = #tpu.dot_dimension_numbers<[1], [0], [0], [1], [0, 0, 1, 1], [], []>} : vector<128x128xbf16>, vector<128x40xbf16>, vector<128x40xf32> -> vector<128x40xf32>
    %c0_5 = arith.constant 0 : index
    %c0_6 = arith.constant 0 : index
    %7 = vector.load %arg3[%c0_5, %c0_6] : memref<8x128xf32, #tpu.memory_space<vmem>>, vector<1x40xf32>
    %8 = vector.extract_strided_slice %3 {offsets = [0, 0], sizes = [128, 40], strides = [1, 1]} : vector<128x256xf32> to vector<128x40xf32>
    %9 = arith.addf %8, %6 : vector<128x40xf32>
    %10 = vector.broadcast %7 : vector<1x40xf32> to vector<128x40xf32>
    %11 = arith.addf %9, %10 : vector<128x40xf32>
    %cst_7 = arith.constant 0.000000e+00 : f32
    %12 = vector.broadcast %cst_7 : f32 to vector<128x40xf32>
    %13 = arith.maximumf %11, %12 : vector<128x40xf32>
    %14 = arith.truncf %13 : vector<128x40xf32> to vector<128x40xbf16>
    %c80 = arith.constant 80 : index
    %c0_8 = arith.constant 0 : index
    %15 = vector.load %arg2[%c80, %c0_8] : memref<160x256xbf16, #tpu.memory_space<vmem>>, vector<40x256xbf16>
    %cst_9 = arith.constant dense<0.000000e+00> : vector<128x256xf32>
    %16 = tpu.matmul %14, %15, %cst_9 {dimension_numbers = #tpu.dot_dimension_numbers<[1], [0], [0], [1], [0, 0, 1, 1], [], []>} : vector<128x40xbf16>, vector<40x256xbf16>, vector<128x256xf32> -> vector<128x256xf32>
    %17 = vector.extract_strided_slice %16 {offsets = [0, 128], sizes = [128, 20], strides = [1, 1]} : vector<128x256xf32> to vector<128x20xf32>
    %18 = arith.truncf %17 : vector<128x20xf32> to vector<128x20xbf16>
    %cst_10 = arith.constant dense<0.000000e+00> : vector<128x20xf32>
    %19 = tpu.matmul %1, %18, %cst_10 {dimension_numbers = #tpu.dot_dimension_numbers<[1], [0], [0], [1], [0, 0, 1, 1], [], []>} : vector<128x128xbf16>, vector<128x20xbf16>, vector<128x20xf32> -> vector<128x20xf32>
    %c1 = arith.constant 1 : index
    %c0_11 = arith.constant 0 : index
    %20 = vector.load %arg3[%c1, %c0_11] : memref<8x128xf32, #tpu.memory_space<vmem>>, vector<1x20xf32>
    %21 = vector.extract_strided_slice %16 {offsets = [0, 0], sizes = [128, 20], strides = [1, 1]} : vector<128x256xf32> to vector<128x20xf32>
    %22 = arith.addf %21, %19 : vector<128x20xf32>
    %23 = vector.broadcast %20 : vector<1x20xf32> to vector<128x20xf32>
    %24 = arith.addf %22, %23 : vector<128x20xf32>
    %cst_12 = arith.constant 0.000000e+00 : f32
    %25 = vector.broadcast %cst_12 : f32 to vector<128x20xf32>
    %26 = arith.maximumf %24, %25 : vector<128x20xf32>
    %27 = vector.shape_cast %26 : vector<128x20xf32> to vector<16x8x20xf32>
    %cst_13 = arith.constant dense<0.000000e+00> : vector<16x20xf32>
    %28 = vector.multi_reduction <add>, %27, %cst_13 [1] : vector<16x8x20xf32> to vector<16x20xf32>
    %29 = arith.truncf %28 : vector<16x20xf32> to vector<16x20xbf16>
    %c128_14 = arith.constant 128 : index
    %c0_15 = arith.constant 0 : index
    %30 = vector.load %arg2[%c128_14, %c0_15] : memref<160x256xbf16, #tpu.memory_space<vmem>>, vector<20x128xbf16>
    %cst_16 = arith.constant dense<0.000000e+00> : vector<16x128xf32>
    %31 = tpu.matmul %29, %30, %cst_16 {dimension_numbers = #tpu.dot_dimension_numbers<[1], [0], [0], [1], [0, 0, 1, 1], [], []>} : vector<16x20xbf16>, vector<20x128xbf16>, vector<16x128xf32> -> vector<16x128xf32>
    %c2 = arith.constant 2 : index
    %c0_17 = arith.constant 0 : index
    %32 = vector.load %arg3[%c2, %c0_17] : memref<8x128xf32, #tpu.memory_space<vmem>>, vector<1x128xf32>
    %33 = vector.broadcast %32 : vector<1x128xf32> to vector<16x128xf32>
    %34 = arith.addf %31, %33 : vector<16x128xf32>
    %35 = tpu.iota {dimensions = array<i32: 1>} : vector<16x128xi32>
    %c5_i32 = arith.constant 5 : i32
    %36 = vector.broadcast %c5_i32 : i32 to vector<16x128xi32>
    %37 = arith.cmpi slt, %35, %36 : vector<16x128xi32>
    %cst_18 = arith.constant -1.000000e+30 : f32
    %38 = vector.broadcast %cst_18 : f32 to vector<16x128xf32>
    %39 = arith.select %37, %34, %38 : vector<16x128xi1>, vector<16x128xf32>
    %cst_19 = arith.constant dense<0xFF800000> : vector<16xf32>
    %40 = vector.multi_reduction <maximumf>, %39, %cst_19 [1] : vector<16x128xf32> to vector<16xf32>
    %41 = vector.shape_cast %40 : vector<16xf32> to vector<16x1xf32>
    %42 = vector.broadcast %41 : vector<16x1xf32> to vector<16x128xf32>
    %43 = arith.subf %34, %42 : vector<16x128xf32>
    %44 = math.exp %43 : vector<16x128xf32>
    %cst_20 = arith.constant 0.000000e+00 : f32
    %45 = vector.broadcast %cst_20 : f32 to vector<16x128xf32>
    %46 = arith.select %37, %44, %45 : vector<16x128xi1>, vector<16x128xf32>
    %cst_21 = arith.constant dense<0.000000e+00> : vector<16xf32>
    %47 = vector.multi_reduction <add>, %46, %cst_21 [1] : vector<16x128xf32> to vector<16xf32>
    %48 = vector.shape_cast %47 : vector<16xf32> to vector<16x1xf32>
    %49 = math.log %48 : vector<16x1xf32>
    %50 = vector.broadcast %49 : vector<16x1xf32> to vector<16x128xf32>
    %51 = arith.subf %43, %50 : vector<16x128xf32>
    %c0_22 = arith.constant 0 : index
    %c0_23 = arith.constant 0 : index
    %52 = vector.load %arg4[%c0_22, %c0_23] : memref<16x128xf32, #tpu.memory_space<vmem>>, vector<16x128xf32>
    tpu.vector_store %arg4[%c0_22, %c0_23], %51 {strides = array<i32>} : memref<16x128xf32, #tpu.memory_space<vmem>>, vector<16x128xf32>,
    return
  }
  func.func @transform_0(%arg0: i32) -> (i32, i32) {
    %c0_i32 = arith.constant 0 : i32
    %c0_i32_0 = arith.constant 0 : i32
    return %arg0, %c0_i32 : i32, i32
  }
  func.func @transform_1(%arg0: i32) -> (i32, i32) {
    %c0_i32 = arith.constant 0 : i32
    %c0_i32_0 = arith.constant 0 : i32
    %c0_i32_1 = arith.constant 0 : i32
    return %c0_i32, %c0_i32_0 : i32, i32
  }
  func.func @transform_2(%arg0: i32) -> (i32, i32) {
    %c0_i32 = arith.constant 0 : i32
    %c0_i32_0 = arith.constant 0 : i32
    %c0_i32_1 = arith.constant 0 : i32
    return %c0_i32, %c0_i32_0 : i32, i32
  }
  func.func @transform_3(%arg0: i32) -> (i32, i32) {
    %c0_i32 = arith.constant 0 : i32
    %c0_i32_0 = arith.constant 0 : i32
    return %arg0, %c0_i32 : i32, i32
  }
}

</mosaic_0001>

<bundles_post_ra>
// kernel: net_forward.1
= control target key start
LH: loop header
LB: loop body
LE: loop exit
PB: predicated region body
PF: predicated region fallthrough
CT: control target
= control target key end

     0   :  { %8 = vsyncpa [#allocation3], 0  ;;  %s1801_s0 = inlined_call_operand.hbm [shape: bf16[128,256], index: 0, kind: input, shape index: {}]   ;;  %s1802_s1 = inlined_call_operand.hbm [shape: bf16[160,256], index: 1, kind: input, shape index: {}]   ;;  %s1803_s2 = inlined_call_operand.hbm [shape: f32[8,128], index: 2, kind: input, shape index: {}]   ;;  %s1804_s3 = inlined_call_operand.hbm [shape: f32[16,128], index: 3, kind: output, shape index: {}]  }
   0x1   :  { %9 = vsyncpa [#allocation6], 0 }
   0x2   :  { %10 = vsyncpa [#allocation4], 0  ;;  %s1481_s12 = smov [#allocation5]   ;;  %s1482_s14 = smov [#allocation2]  }
   0x3   :  { %s28_s13 = sshll.u32 %s1481_s12, 4  ;;  %s16_s15 = sshll.u32 %s1482_s14, 4  ;;  %s29_s13 = int_to_ptr.vmem [resolvable:$true] %s28_s13  ;;  %s1510_s15 = int_to_ptr.vmem [resolvable:$true] %s16_s15 }
   0x4   :  { %s1387_s18 = scalar_lea.hbm %s1802_s1, 2560 }
   0x5   :  { %p1388_p0 = scmp.ne.s32.totalorder %s1802_s1, %s1387_s18  ;;  %p1391_p1 = scmp.lt.u32.totalorder %s1387_s18, %s1802_s1 }
   0x7   :  { %p1393_p2 = pnand %p1391_p1, %p1388_p0 }
   0x9   :  { %1396 = shalt.err (!%p1393_p2)
}
   0xa   :  { %s1397_s23 = scalar_lea.vmem %s29_s13, 2560  ;;  %p1402_p4 = scmp.lt.s32.totalorder %s29_s13, %s29_s13 }
   0xb   :  { %p1398_p3 = scmp.ne.s32.totalorder %s29_s13, %s1397_s23  ;;  %p1403_p5 = scmp.lt.s32.totalorder %s1397_s23, %s1397_s23 }
   0xd   :  { %p1404_p6 = por %p1403_p5, %p1402_p4 }
   0xf   :  { %p1405_p7 = pnand %p1404_p6, %p1398_p3 }
  0x11   :  { %1408 = shalt.err (!%p1405_p7)
}
  0x12   :  { %s1483_s24 = smov 128   ;;  %s1484_s25 = smov 8  }
  0x13   :  { %34 = dma.hbm_to_vmem [thread:$0]  %s1802_s1, 2560, %s29_s13, [#allocation6], %s1483_s24, %s1483_s24, %s1484_s25  }
  0x14   :  { %s1409_s30 = scalar_lea.hbm %s1801_s0, 2048 }
  0x15   :  { %p1410_p8 = scmp.ne.s32.totalorder %s1801_s0, %s1409_s30  ;;  %p1413_p9 = scmp.lt.u32.totalorder %s1409_s30, %s1801_s0 }
  0x17   :  { %p1415_p10 = pnand %p1413_p9, %p1410_p8 }
  0x19   :  { %1418 = shalt.err (!%p1415_p10)
}
  0x1a   :  { %s1419_s8 = scalar_lea.vmem %s1510_s15, 2048  ;;  %p1424_p12 = scmp.lt.s32.totalorder %s1510_s15, %s1510_s15 }
  0x1b   :  { %p1420_p11 = scmp.ne.s32.totalorder %s1510_s15, %s1419_s8  ;;  %p1425_p13 = scmp.lt.s32.totalorder %s1419_s8, %s1419_s8 }
  0x1d   :  { %p1426_p0 = por %p1425_p13, %p1424_p12 }
  0x1f   :  { %p1427_p1 = pnand %p1426_p0, %p1420_p11 }
  0x21   :  { %1430 = shalt.err (!%p1427_p1)
}
  0x22   :  { %22 = dma.hbm_to_vmem [thread:$0]  %s1801_s0, 2048, %s1510_s15, [#allocation3], %s1483_s24, %s1483_s24, %s1484_s25  }
  0x23   :  { %s1485_s10 = smov [#allocation7]   ;;  %s1431_s14 = scalar_lea.hbm %s1803_s2, 128 }
  0x24   :  { %s41_s11 = sshll.u32 %s1485_s10, 4  ;;  %p1432_p2 = scmp.ne.s32.totalorder %s1803_s2, %s1431_s14  ;;  %s42_s11 = int_to_ptr.vmem [resolvable:$true] %s41_s11 }
  0x25   :  { %p1435_p3 = scmp.lt.u32.totalorder %s1431_s14, %s1803_s2 }
  0x27   :  { %p1437_p4 = pnand %p1435_p3, %p1432_p2 }
  0x29   :  { %1440 = shalt.err (!%p1437_p4)
}
  0x2a   :  { %s1441_s20 = scalar_lea.vmem %s42_s11, 128  ;;  %p1446_p6 = scmp.lt.s32.totalorder %s42_s11, %s42_s11 }
  0x2b   :  { %p1442_p5 = scmp.ne.s32.totalorder %s42_s11, %s1441_s20  ;;  %p1447_p7 = scmp.lt.s32.totalorder %s1441_s20, %s1441_s20 }
  0x2d   :  { %p1448_p8 = por %p1447_p7, %p1446_p6 }
  0x2f   :  { %p1449_p9 = pnand %p1448_p8, %p1442_p5 }
  0x31   :  { %1452 = shalt.err (!%p1449_p9)
}
  0x32   :  { %44 = dma.hbm_to_vmem [thread:$0]  %s1803_s2, 128, %s42_s11, [#allocation6]  }
  0x33   :  { %1475 = dma.done.wait [#allocation3], 2048  }
  0x34   :  { %1476 = vsyncadd [#allocation3], 4294965248 }
  0x35   :  { %1477 = dma.done.wait [#allocation6], 2688  }
  0x36   :  { %1478 = vsyncadd [#allocation6], 4294964608  ;;  %v1486_v0 = vmov 0   ;;  %v1338_v1 = vld [vmem:[#allocation5 + $0x4] ss:$8 sps:$4 sm:$0xff]   ;;  %vm187_vm0 = vcmask 654336  }
  0x37   :  { %244 = vmatprep.mubr.bf16.mxu0 %v1486_v0  ;;  %v1340_v2 = vld [vmem:[#allocation5] ss:$8 sps:$4 sm:$0xff]   ;;  %212 = vmatprep.subr.bf16.mxu0 %v1338_v1  ;;  %v1341_v3 = vld [vmem:[#allocation5 + $0x14] ss:$8 sps:$4 sm:$0xff]   ;;  %v1343_v4 = vld [vmem:[#allocation5 + $0x10] ss:$8 sps:$4 sm:$0xff]  }
  0x38   :  { %213 = vmatpush1.bf16.msra.mxu0 %v1340_v2  ;;  %v1344_v5 = vld [vmem:[#allocation5 + $0x24] ss:$8 sps:$4 sm:$0xff]   ;;  %v1346_v6 = vld [vmem:[#allocation5 + $0x20] ss:$8 sps:$4 sm:$0xff]   ;;  %v1347_v7 = vld [vmem:[#allocation5 + $0x34] ss:$8 sps:$4 sm:$0xff]  }
  0x39   :  { %214 = vmatprep.subr.bf16.mxu0 %v1341_v3  ;;  %v1349_v8 = vld [vmem:[#allocation5 + $0x30] ss:$8 sps:$4 sm:$0xff]   ;;  %v1350_v9 = vld [vmem:[#allocation5 + $0x44] ss:$8 sps:$4 sm:$0xff]   ;;  %v1352_v10 = vld [vmem:[#allocation5 + $0x40] ss:$8 sps:$4 sm:$0xff]  }
  0x3a   :  { %v1353_v11 = vld [vmem:[#allocation2] ss:$8 sps:$4 sm:$0xff]   ;;  %v1354_v12 = vld [vmem:[#allocation2 + $0x10] ss:$8 sps:$4 sm:$0xff]   ;;  %v1361_v19 = vld [vmem:[#allocation2 + $0x4] ss:$8 sps:$4 sm:$0xff]  }
  0x3b   :  { %v1355_v13 = vld [vmem:[#allocation2 + $0x20] ss:$8 sps:$4 sm:$0xff]   ;;  %v1356_v14 = vld [vmem:[#allocation2 + $0x30] ss:$8 sps:$4 sm:$0xff]   ;;  %1273 = vmatprep.mubr.bf16.mxu1 %v1361_v19  ;;  %v1371_v60 = vld [vmem:[#allocation5 + $0x54] ss:$8 sps:$4 sm:$0xff]  }
  0x3c   :  { %215 = vmatpush1.bf16.msra.mxu0 %v1343_v4  ;;  %v1357_v15 = vld [vmem:[#allocation2 + $0x40] ss:$8 sps:$4 sm:$0xff]   ;;  %v1358_v16 = vld [vmem:[#allocation2 + $0x50] ss:$8 sps:$4 sm:$0xff]   ;;  %v1607_v61 = vld [vmem:[#allocation2 + $0x14] ss:$8 sps:$4 sm:$0xff]  }
  0x3d   :  { %216 = vmatprep.subr.bf16.mxu0 %v1344_v5  ;;  %v1359_v17 = vld [vmem:[#allocation2 + $0x60] ss:$8 sps:$4 sm:$0xff]   ;;  %v1360_v18 = vld [vmem:[#allocation2 + $0x70] ss:$8 sps:$4 sm:$0xff]   ;;  %v1609_v62 = vld [vmem:[#allocation2 + $0x24] ss:$8 sps:$4 sm:$0xff]  }
  0x3e   :  { %v1369_v63 = vld [vmem:[#allocation5 + $0x50] ss:$8 sps:$4 sm:$0xff]   ;;  %v1374_v1 = vld [vmem:[#allocation5 + $0x64] ss:$8 sps:$4 sm:$0xff]   ;;  %v1372_v2 = vld [vmem:[#allocation5 + $0x60] ss:$8 sps:$4 sm:$0xff]  }
  0x3f   :  { %v1613_v3 = vld [vmem:[#allocation2 + $0x34] ss:$8 sps:$4 sm:$0xff]   ;;  %v1615_v4 = vld [vmem:[#allocation2 + $0x44] ss:$8 sps:$4 sm:$0xff]   ;;  %vm594_vm1 = vcmask 1043456   ;;  %vm569_vm2 = vcmask 326656  }
  0x40   :  { %217 = vmatpush1.bf16.msra.mxu0 %v1346_v6  ;;  %v1619_v5 = vld [vmem:[#allocation2 + $0x54] ss:$8 sps:$4 sm:$0xff]   ;;  %v1621_v6 = vld [vmem:[#allocation2 + $0x64] ss:$8 sps:$4 sm:$0xff]   ;;  %vm1075_vm3 = vcmask 1041408   ;;  %vm1488_vm4 = vmmov 0  }
  0x41   :  { %218 = vmatprep.subr.bf16.mxu0 %v1347_v7  ;;  %v1625_v7 = vld [vmem:[#allocation2 + $0x74] ss:$8 sps:$4 sm:$0xff]   ;;  %vm872_vm5 = vcmask 162816   ;;  %vm1041_vm6 = vcmask 1041409   ;;  %vm1043_vm7 = vcmask 1042434   ;;  %vm1045_vm8 = vcmask 1043459  }
  0x42   :  { %vm1047_vm9 = vcmask 1044484   ;;  %vm1049_vm10 = vcmask 1045509   ;;  %vm1051_vm11 = vcmask 1046534   ;;  %vm1053_vm12 = vcmask 1047559   ;;  %s1489_s2 = smov [#allocation8]  }
  0x43   :  { %s1154_s21 = sshll.u32 %s1489_s2, 4  ;;  %s1155_s21 = int_to_ptr.vmem [resolvable:$true] %s1154_s21 }
  0x44   :  { %219 = vmatpush1.bf16.msra.mxu0 %v1349_v8  ;;  %v543_v8 = vld [vmem:[#allocation5 + $0x70] sm:$0xff]  ;;  %s1453_s22 = scalar_lea.vmem %s1155_s21, 256  ;;  %p1458_p11 = scmp.lt.s32.totalorder %s1155_s21, %s1155_s21 }
  0x45   :  { %220 = vmatprep.subr.bf16.mxu0 %v1350_v9  ;;  %v1207_v9 = vcombine.high %v543_v8, %v543_v8  ;;  %p1454_p10 = scmp.ne.s32.totalorder %s1155_s21, %s1453_s22  ;;  %p1459_p12 = scmp.lt.s32.totalorder %s1453_s22, %s1453_s22 }
  0x47   :  { %p1460_p13 = por %p1459_p12, %p1458_p11 }
  0x48   :  { %221 = vmatpush1.bf16.msra.mxu0 %v1352_v10  ;;  %v1206_v10 = vcombine.low %v543_v8, %v543_v8 }
  0x49   :  { %p1461_p0 = pnand %p1460_p13, %p1454_p10 }
  0x4b   :  { %1185 = vmatmul.mubr.msk.bf16.vlgmr.msra.gmra.mrb[0].mxu0 %vm187_vm0, %v1353_v11  ;;  %v596_v11 = vsel %vm594_vm1, %v1206_v10, 0 }
  0x4c   :  { %254 = vmatprep.mubr.bf16.mxu0 %v1486_v0 }
  0x53   :  { %1186 = vmatmul.mubr.msk.bf16.gmra.mrb[4].mxu0 %vm187_vm0, %v1354_v12 }
  0x54   :  { %264 = vmatprep.mubr.bf16.mxu0 %v1486_v0 }
  0x5b   :  { %1187 = vmatmul.mubr.msk.bf16.gmra.mrb[8].mxu0 %vm187_vm0, %v1355_v13  ;;  %v1629_v13 = vld [vmem:[#allocation7] ss:$0 sm:$0xff] }
  0x5c   :  { %274 = vmatprep.mubr.bf16.mxu0 %v1486_v0 }
  0x63   :  { %1188 = vmatmul.mubr.msk.bf16.gmra.mrb[12].mxu0 %vm187_vm0, %v1356_v14 }
  0x64   :  { %284 = vmatprep.mubr.bf16.mxu0 %v1486_v0 }
  0x6b   :  { %1189 = vmatmul.mubr.msk.bf16.gmra.mrb[16].mxu0 %vm187_vm0, %v1357_v15 }
  0x6c   :  { %294 = vmatprep.mubr.bf16.mxu0 %v1486_v0 }
  0x73   :  { %1190 = vmatmul.mubr.msk.bf16.gmra.mrb[20].mxu0 %vm187_vm0, %v1358_v16 }
  0x74   :  { %304 = vmatprep.mubr.bf16.mxu0 %v1486_v0 }
  0x7b   :  { %1191 = vmatmul.mubr.msk.bf16.gmra.mrb[24].mxu0 %vm187_vm0, %v1359_v17 }
  0x7c   :  { %314 = vmatprep.mubr.bf16.mxu0 %v1486_v0 }
  0x83   :  { %1192 = vmatmul.mubr.msk.bf16.gmra.mrb[28].mxu0 %vm187_vm0, %v1360_v18 }
  0x84   :  { %1305 = vmatprep.mubr.bf16.mxu0 %v1361_v19 }
 0x11e   :  { %v1575_v20 = vpop.f32.mrb[0].mxu0 }
 0x11f   :  { %v248_v21 = vpop.f32.mrb[1].mxu0 }
 0x120   :  { %v1577_v22 = vpop.f32.mrb[2].mxu0 }
 0x121   :  { %v252_v23 = vpop.f32.mrb[3].mxu0 }
 0x122   :  { %v325_v24 = vpack.c.bf16 %v252_v23, %v248_v21 }
 0x124   :  { %1257 = vmatprep.subr.bf16.mxu1 %v325_v24 }
 0x125   :  { %1258 = vmatpush3.bf16.msra.mxu1 %v325_v24 }
 0x126   :  { %v1579_v25 = vpop.f32.mrb[4].mxu0 }
 0x127   :  { %v258_v26 = vpop.f32.mrb[5].mxu0 }
 0x128   :  { %v1581_v27 = vpop.f32.mrb[6].mxu0 }
 0x129   :  { %v262_v28 = vpop.f32.mrb[7].mxu0 }
 0x12a   :  { %v326_v29 = vpack.c.bf16 %v262_v28, %v258_v26 }
 0x12c   :  { %1259 = vmatprep.subr.bf16.mxu1 %v326_v29 }
 0x12d   :  { %1260 = vmatpush3.bf16.msra.mxu1 %v326_v29 }
 0x12e   :  { %v1583_v30 = vpop.f32.mrb[8].mxu0 }
 0x12f   :  { %v268_v31 = vpop.f32.mrb[9].mxu0 }
 0x130   :  { %v1585_v32 = vpop.f32.mrb[10].mxu0 }
 0x131   :  { %v272_v33 = vpop.f32.mrb[11].mxu0 }
 0x132   :  { %v327_v34 = vpack.c.bf16 %v272_v33, %v268_v31 }
 0x134   :  { %1261 = vmatprep.subr.bf16.mxu1 %v327_v34 }
 0x135   :  { %1262 = vmatpush3.bf16.msra.mxu1 %v327_v34 }
 0x136   :  { %v1587_v35 = vpop.f32.mrb[12].mxu0 }
 0x137   :  { %v278_v36 = vpop.f32.mrb[13].mxu0 }
 0x138   :  { %v1589_v37 = vpop.f32.mrb[14].mxu0 }
 0x139   :  { %v282_v38 = vpop.f32.mrb[15].mxu0 }
 0x13a   :  { %v328_v39 = vpack.c.bf16 %v282_v38, %v278_v36 }
 0x13c   :  { %1263 = vmatprep.subr.bf16.mxu1 %v328_v39 }
 0x13d   :  { %1264 = vmatpush3.bf16.msra.mxu1 %v328_v39 }
 0x13e   :  { %v1591_v40 = vpop.f32.mrb[16].mxu0 }
 0x13f   :  { %v288_v41 = vpop.f32.mrb[17].mxu0 }
 0x140   :  { %v1593_v42 = vpop.f32.mrb[18].mxu0 }
 0x141   :  { %v292_v43 = vpop.f32.mrb[19].mxu0 }
 0x142   :  { %v329_v44 = vpack.c.bf16 %v292_v43, %v288_v41 }
 0x144   :  { %1265 = vmatprep.subr.bf16.mxu1 %v329_v44 }
 0x145   :  { %1266 = vmatpush3.bf16.msra.mxu1 %v329_v44 }
 0x146   :  { %v1595_v45 = vpop.f32.mrb[20].mxu0 }
 0x147   :  { %v298_v46 = vpop.f32.mrb[21].mxu0 }
 0x148   :  { %v1597_v47 = vpop.f32.mrb[22].mxu0 }
 0x149   :  { %v302_v48 = vpop.f32.mrb[23].mxu0 }
 0x14a   :  { %v330_v49 = vpack.c.bf16 %v302_v48, %v298_v46 }
 0x14c   :  { %1267 = vmatprep.subr.bf16.mxu1 %v330_v49 }
 0x14d   :  { %1268 = vmatpush3.bf16.msra.mxu1 %v330_v49 }
 0x14e   :  { %v1599_v50 = vpop.f32.mrb[24].mxu0 }
 0x14f   :  { %v308_v51 = vpop.f32.mrb[25].mxu0 }
 0x150   :  { %v1601_v52 = vpop.f32.mrb[26].mxu0 }
 0x151   :  { %v312_v53 = vpop.f32.mrb[27].mxu0 }
 0x152   :  { %v331_v54 = vpack.c.bf16 %v312_v53, %v308_v51 }
 0x154   :  { %1269 = vmatprep.subr.bf16.mxu1 %v331_v54 }
 0x155   :  { %1270 = vmatpush3.bf16.msra.mxu1 %v331_v54 }
 0x156   :  { %v1603_v55 = vpop.f32.mrb[28].mxu0 }
 0x157   :  { %v318_v56 = vpop.f32.mrb[29].mxu0 }
 0x158   :  { %v1605_v57 = vpop.f32.mrb[30].mxu0 }
 0x159   :  { %v322_v58 = vpop.f32.mrb[31].mxu0 }
 0x15a   :  { %v332_v59 = vpack.c.bf16 %v322_v58, %v318_v56 }
 0x15c   :  { %1271 = vmatprep.subr.bf16.mxu1 %v332_v59 }
 0x15d   :  { %1272 = vmatpush3.bf16.msra.mxu1 %v332_v59 }
 0x15e   :  { %601 = vmatprep.subr.bf16.mxu1 %v1371_v60 }
 0x160   :  { %1274 = vmatmul.mubr.bf16.vlgmr.msra.gmra.mrb[0].mxu1 %v1607_v61 }
 0x161   :  { %1277 = vmatprep.mubr.bf16.mxu1 %v1609_v62  ;;  %602 = vmatpush1.bf16.msra.mxu1 %v1369_v63 }
 0x162   :  { %603 = vmatprep.subr.bf16.mxu1 %v1374_v1 }
 0x165   :  { %604 = vmatpush1.bf16.msra.mxu1 %v1372_v2 }
 0x166   :  { %1208 = vmatprep.subr.msk.bf16.mxu1 %vm594_vm1, %v1207_v9 }
 0x168   :  { %1278 = vmatmul.mubr.bf16.gmra.mrb[4].mxu1 %v1613_v3 }
 0x169   :  { %1281 = vmatprep.mubr.bf16.mxu1 %v1615_v4  ;;  %606 = vmatpush1.bf16.msra.mxu1 %v596_v11 }
 0x170   :  { %1282 = vmatmul.mubr.bf16.gmra.mrb[8].mxu1 %v1619_v5 }
 0x171   :  { %1285 = vmatprep.mubr.bf16.mxu1 %v1621_v6 }
 0x178   :  { %1286 = vmatmul.mubr.bf16.gmra.mrb[12].mxu1 %v1625_v7 }
 0x179   :  { %633 = vmatprep.mubr.bf16.mxu1 %v1486_v0 }
 0x233   :  { %v1275_v12 = vpop.f32.mrb[0].mxu1 }
 0x234   :  { %v481_v14 = vadd.f32 %v1275_v12, %v1579_v25  ;;  %v415_v15 = vpop.f32.mrb[1].mxu1 }
 0x235   :  { %v479_v16 = vadd.f32 %v415_v15, %v1575_v20  ;;  %v1276_v17 = vpop.f32.mrb[2].mxu1 }
 0x236   :  { %v501_v18 = vadd.f32 %v1629_v13, %v481_v14  ;;  %v482_v19 = vadd.f32 %v1276_v17, %v1581_v27  ;;  %v418_v21 = vpop.f32.mrb[3].mxu1 }
 0x237   :  { %v499_v23 = vadd.f32 %v1629_v13, %v479_v16  ;;  %v480_v24 = vadd.f32 %v418_v21, %v1577_v22 }
 0x238   :  { %v502_v26 = vadd.f32 %v1629_v13, %v482_v19  ;;  %v517_v29 = vmax.f32 %v501_v18, 0.0 }
 0x239   :  { %v500_v28 = vadd.f32 %v1629_v13, %v480_v24  ;;  %v515_v25 = vmax.f32 %v499_v23, 0.0 }
 0x23a   :  { %v518_v31 = vmax.f32 %v502_v26, 0.0 }
 0x23b   :  { %v516_v33 = vmax.f32 %v500_v28, 0.0  ;;  %v1279_v34 = vpop.f32.mrb[4].mxu1 }
 0x23c   :  { %v532_v20 = vpack.c.bf16 %v518_v31, %v517_v29  ;;  %v485_v36 = vadd.f32 %v1279_v34, %v1587_v35  ;;  %v431_v38 = vpop.f32.mrb[5].mxu1 }
 0x23d   :  { %v531_v27 = vpack.c.bf16 %v516_v33, %v515_v25  ;;  %v483_v39 = vadd.f32 %v431_v38, %v1583_v30  ;;  %v1280_v41 = vpop.f32.mrb[6].mxu1 }
 0x23e   :  { %v505_v22 = vadd.f32 %v1629_v13, %v485_v36  ;;  %v486_v43 = vadd.f32 %v1280_v41, %v1589_v37  ;;  %v434_v44 = vpop.f32.mrb[7].mxu1 }
 0x23f   :  { %v503_v46 = vadd.f32 %v1629_v13, %v483_v39  ;;  %v484_v48 = vadd.f32 %v434_v44, %v1585_v32  ;;  %1209 = vmatmul.mubr.msk.bf16.vlgmr.msra.gmra.mrb[16].mxu1 %vm569_vm2, %v531_v27 }
 0x240   :  { %v506_v49 = vadd.f32 %v1629_v13, %v486_v43  ;;  %643 = vmatprep.mubr.bf16.mxu1 %v1486_v0  ;;  %v521_v51 = vmax.f32 %v505_v22, 0.0 }
 0x241   :  { %v504_v35 = vadd.f32 %v1629_v13, %v484_v48  ;;  %v519_v53 = vmax.f32 %v503_v46, 0.0 }
 0x242   :  { %v522_v30 = vmax.f32 %v506_v49, 0.0 }
 0x243   :  { %v520_v54 = vmax.f32 %v504_v35, 0.0  ;;  %v1283_v56 = vpop.f32.mrb[8].mxu1 }
 0x244   :  { %v534_v58 = vpack.c.bf16 %v522_v30, %v521_v51  ;;  %v489_v37 = vadd.f32 %v1283_v56, %v1595_v45  ;;  %v447_v59 = vpop.f32.mrb[9].mxu1 }
 0x245   :  { %v533_v60 = vpack.c.bf16 %v520_v54, %v519_v53  ;;  %v487_v32 = vadd.f32 %v447_v59, %v1591_v40  ;;  %v1284_v63 = vpop.f32.mrb[10].mxu1 }
 0x246   :  { %v509_v1 = vadd.f32 %v1629_v13, %v489_v37  ;;  %v490_v2 = vadd.f32 %v1284_v63, %v1597_v47  ;;  %v450_v8 = vpop.f32.mrb[11].mxu1 }
 0x247   :  { %v507_v9 = vadd.f32 %v1629_v13, %v487_v32  ;;  %v488_v10 = vadd.f32 %v450_v8, %v1593_v42  ;;  %1210 = vmatmul.mubr.msk.bf16.gmra.mrb[20].mxu1 %vm569_vm2, %v532_v20 }
 0x248   :  { %v510_v11 = vadd.f32 %v1629_v13, %v490_v2  ;;  %653 = vmatprep.mubr.bf16.mxu1 %v1486_v0  ;;  %v525_v12 = vmax.f32 %v509_v1, 0.0 }
 0x249   :  { %v508_v45 = vadd.f32 %v1629_v13, %v488_v10  ;;  %v523_v14 = vmax.f32 %v507_v9, 0.0 }
 0x24a   :  { %v526_v40 = vmax.f32 %v510_v11, 0.0 }
 0x24b   :  { %v524_v15 = vmax.f32 %v508_v45, 0.0  ;;  %v1287_v16 = vpop.f32.mrb[12].mxu1 }
 0x24c   :  { %v536_v17 = vpack.c.bf16 %v526_v40, %v525_v12  ;;  %v493_v47 = vadd.f32 %v1287_v16, %v1603_v55  ;;  %v463_v18 = vpop.f32.mrb[13].mxu1 }
 0x24d   :  { %v535_v19 = vpack.c.bf16 %v524_v15, %v523_v14  ;;  %v491_v42 = vadd.f32 %v463_v18, %v1599_v50  ;;  %v1288_v21 = vpop.f32.mrb[14].mxu1  ;;  %v1377_v18 = vld [vmem:[#allocation5 + $0x80] ss:$8 sps:$4 sm:$0xff]  }
 0x24e   :  { %v513_v23 = vadd.f32 %v1629_v13, %v493_v47  ;;  %v494_v24 = vadd.f32 %v1288_v21, %v1605_v57  ;;  %v466_v26 = vpop.f32.mrb[15].mxu1 }
 0x24f   :  { %v511_v28 = vadd.f32 %v1629_v13, %v491_v42  ;;  %v492_v29 = vadd.f32 %v466_v26, %v1601_v52  ;;  %1211 = vmatmul.mubr.msk.bf16.gmra.mrb[24].mxu1 %vm569_vm2, %v533_v60  ;;  %v1378_v42 = vld [vmem:[#allocation5 + $0x90] ss:$0 sps:$4 sm:$0x33]  }
 0x250   :  { %v514_v31 = vadd.f32 %v1629_v13, %v494_v24  ;;  %663 = vmatprep.mubr.bf16.mxu1 %v1486_v0  ;;  %v529_v25 = vmax.f32 %v513_v23, 0.0 }
 0x251   :  { %v512_v55 = vadd.f32 %v1629_v13, %v492_v29  ;;  %v527_v33 = vmax.f32 %v511_v28, 0.0 }
 0x252   :  { %v530_v50 = vmax.f32 %v514_v31, 0.0 }
 0x253   :  { %v528_v34 = vmax.f32 %v512_v55, 0.0 }
 0x254   :  { %v538_v20 = vpack.c.bf16 %v530_v50, %v529_v25 }
 0x255   :  { %v537_v36 = vpack.c.bf16 %v528_v34, %v527_v33 }
 0x257   :  { %1212 = vmatmul.mubr.msk.bf16.gmra.mrb[28].mxu1 %vm569_vm2, %v534_v58 }
 0x258   :  { %673 = vmatprep.mubr.bf16.mxu1 %v1486_v0 }
 0x25f   :  { %1213 = vmatmul.mubr.msk.bf16.gmra.mrb[32].mxu1 %vm569_vm2, %v535_v19  ;;  %v1487_v19 = vmov 0.0  }
 0x260   :  { %683 = vmatprep.mubr.bf16.mxu1 %v1486_v0 }
 0x267   :  { %1214 = vmatmul.mubr.msk.bf16.gmra.mrb[36].mxu1 %vm569_vm2, %v536_v17 }
 0x268   :  { %693 = vmatprep.mubr.bf16.mxu1 %v1486_v0 }
 0x26f   :  { %1215 = vmatmul.mubr.msk.bf16.gmra.mrb[40].mxu1 %vm569_vm2, %v537_v36 }
 0x270   :  { %703 = vmatprep.mubr.bf16.mxu1 %v1486_v0 }
 0x277   :  { %1216 = vmatmul.mubr.msk.bf16.gmra.mrb[44].mxu1 %vm569_vm2, %v538_v20 }
 0x312   :  { %v1678_v52 = vpop.f32.mrb[16].mxu1 }
 0x313   :  { %v637_v57 = vpop.f32.mrb[17].mxu1 }
 0x314   :  { %v1680_v13 = vpop.f32.mrb[18].mxu1 }
 0x315   :  { %v641_v38 = vpop.f32.mrb[19].mxu1 }
 0x316   :  { %v714_v27 = vpack.c.bf16 %v641_v38, %v637_v57 }
 0x318   :  { %1289 = vmatprep.subr.bf16.mxu0 %v714_v27 }
 0x319   :  { %1290 = vmatpush3.bf16.msra.mxu0 %v714_v27 }
 0x31a   :  { %v1682_v39 = vpop.f32.mrb[20].mxu1 }
 0x31b   :  { %v647_v41 = vpop.f32.mrb[21].mxu1 }
 0x31c   :  { %v1684_v22 = vpop.f32.mrb[22].mxu1 }
 0x31d   :  { %v651_v43 = vpop.f32.mrb[23].mxu1 }
 0x31e   :  { %v715_v44 = vpack.c.bf16 %v651_v43, %v647_v41 }
 0x320   :  { %1291 = vmatprep.subr.bf16.mxu0 %v715_v44 }
 0x321   :  { %1292 = vmatpush3.bf16.msra.mxu0 %v715_v44 }
 0x322   :  { %v1686_v0 = vpop.f32.mrb[24].mxu1 }
 0x323   :  { %v657_v46 = vpop.f32.mrb[25].mxu1 }
 0x324   :  { %v1688_v48 = vpop.f32.mrb[26].mxu1 }
 0x325   :  { %v661_v49 = vpop.f32.mrb[27].mxu1 }
 0x326   :  { %v716_v35 = vpack.c.bf16 %v661_v49, %v657_v46 }
 0x328   :  { %1293 = vmatprep.subr.bf16.mxu0 %v716_v35 }
 0x329   :  { %1294 = vmatpush3.bf16.msra.mxu0 %v716_v35 }
 0x32a   :  { %v1690_v51 = vpop.f32.mrb[28].mxu1 }
 0x32b   :  { %v667_v30 = vpop.f32.mrb[29].mxu1 }
 0x32c   :  { %v1692_v53 = vpop.f32.mrb[30].mxu1 }
 0x32d   :  { %v671_v54 = vpop.f32.mrb[31].mxu1 }
 0x32e   :  { %v717_v56 = vpack.c.bf16 %v671_v54, %v667_v30 }
 0x330   :  { %1295 = vmatprep.subr.bf16.mxu0 %v717_v56 }
 0x331   :  { %1296 = vmatpush3.bf16.msra.mxu0 %v717_v56 }
 0x332   :  { %v1694_v58 = vpop.f32.mrb[32].mxu1 }
 0x333   :  { %v677_v37 = vpop.f32.mrb[33].mxu1 }
 0x334   :  { %v1696_v59 = vpop.f32.mrb[34].mxu1 }
 0x335   :  { %v681_v60 = vpop.f32.mrb[35].mxu1 }
 0x336   :  { %v718_v32 = vpack.c.bf16 %v681_v60, %v677_v37 }
 0x338   :  { %1297 = vmatprep.subr.bf16.mxu0 %v718_v32 }
 0x339   :  { %1298 = vmatpush3.bf16.msra.mxu0 %v718_v32 }
 0x33a   :  { %v1698_v63 = vpop.f32.mrb[36].mxu1 }
 0x33b   :  { %v687_v1 = vpop.f32.mrb[37].mxu1 }
 0x33c   :  { %v1700_v2 = vpop.f32.mrb[38].mxu1 }
 0x33d   :  { %v691_v8 = vpop.f32.mrb[39].mxu1 }
 0x33e   :  { %v719_v9 = vpack.c.bf16 %v691_v8, %v687_v1 }
 0x340   :  { %1299 = vmatprep.subr.bf16.mxu0 %v719_v9 }
 0x341   :  { %1300 = vmatpush3.bf16.msra.mxu0 %v719_v9 }
 0x342   :  { %v1702_v10 = vpop.f32.mrb[40].mxu1 }
 0x343   :  { %v697_v11 = vpop.f32.mrb[41].mxu1 }
 0x344   :  { %v1704_v45 = vpop.f32.mrb[42].mxu1 }
 0x345   :  { %v701_v12 = vpop.f32.mrb[43].mxu1 }
 0x346   :  { %v720_v40 = vpack.c.bf16 %v701_v12, %v697_v11 }
 0x348   :  { %1301 = vmatprep.subr.bf16.mxu0 %v720_v40 }
 0x349   :  { %1302 = vmatpush3.bf16.msra.mxu0 %v720_v40 }
 0x34a   :  { %v1706_v14 = vpop.f32.mrb[44].mxu1 }
 0x34b   :  { %v707_v15 = vpop.f32.mrb[45].mxu1 }
 0x34c   :  { %v1708_v16 = vpop.f32.mrb[46].mxu1 }
 0x34d   :  { %v711_v17 = vpop.f32.mrb[47].mxu1 }
 0x34e   :  { %v721_v47 = vpack.c.bf16 %v711_v17, %v707_v15 }
 0x350   :  { %1303 = vmatprep.subr.bf16.mxu0 %v721_v47 }
 0x351   :  { %1304 = vmatpush3.bf16.msra.mxu0 %v721_v47 }
 0x352   :  { %1321 = vmatprep.subr.bf16.mxu0 %v1487_v19 }
 0x354   :  { %1306 = vmatmul.mubr.bf16.vlgmr.msra.gmra.mrb[32].mxu0 %v1607_v61  ;;  %v1077_v61 = vsel %vm1075_vm3, %v1378_v42, 0 }
 0x355   :  { %1309 = vmatprep.mubr.bf16.mxu0 %v1609_v62  ;;  %1322 = vmatpush3.bf16.msra.mxu0 %v1377_v18 }
 0x356   :  { %1323 = vmatprep.subr.bf16.mxu0 %v1487_v19 }
 0x359   :  { %1324 = vmatpush3.bf16.msra.mxu0 %v1077_v61 }
 0x35c   :  { %1310 = vmatmul.mubr.bf16.gmra.mrb[36].mxu0 %v1613_v3  ;;  %v1717_v3 = vld [vmem:[#allocation7 + $0x1] ss:$0 sm:$0xff] }
 0x35d   :  { %1313 = vmatprep.mubr.bf16.mxu0 %v1615_v4 }
 0x364   :  { %1314 = vmatmul.mubr.bf16.gmra.mrb[40].mxu0 %v1619_v5 }
 0x365   :  { %1317 = vmatprep.mubr.bf16.mxu0 %v1621_v6 }
 0x36c   :  { %1318 = vmatmul.mubr.bf16.gmra.mrb[44].mxu0 %v1625_v7 }
 0x36d   :  { %1325 = vmatprep.mubr.msk.bf16.mxu0 %vm1488_vm4, %v1487_v19 }
 0x427   :  { %v1307_v62 = vpop.f32.mrb[32].mxu0 }
 0x428   :  { %v822_v4 = vadd.f32 %v1307_v62, %v1682_v39  ;;  %v756_v5 = vpop.f32.mrb[33].mxu0 }
 0x429   :  { %v820_v6 = vadd.f32 %v756_v5, %v1678_v52  ;;  %v1308_v7 = vpop.f32.mrb[34].mxu0 }
 0x42a   :  { %v842_v21 = vadd.f32 %v1717_v3, %v822_v4  ;;  %v823_v23 = vadd.f32 %v1308_v7, %v1684_v22  ;;  %v759_v24 = vpop.f32.mrb[35].mxu0 }
 0x42b   :  { %v840_v26 = vadd.f32 %v1717_v3, %v820_v6  ;;  %v821_v28 = vadd.f32 %v759_v24, %v1680_v13 }
 0x42c   :  { %v858_v29 = vmax.f32 %v842_v21, 0.0  ;;  %v843_v31 = vadd.f32 %v1717_v3, %v823_v23 }
 0x42d   :  { %v856_v55 = vmax.f32 %v840_v26, 0.0  ;;  %v841_v25 = vadd.f32 %v1717_v3, %v821_v28 }
 0x42e   :  { %v887_v50 = vsel %vm872_vm5, %v858_v29, 0.0  ;;  %v859_v33 = vmax.f32 %v843_v31, 0.0 }
 0x42f   :  { %v888_v34 = vrot.slane %v887_v50, 4  ;;  %v873_v20 = vsel %vm872_vm5, %v856_v55, 0.0  ;;  %v857_v36 = vmax.f32 %v841_v25, 0.0  ;;  %v1311_v52 = vpop.f32.mrb[36].mxu0 }
 0x430   :  { %v874_v57 = vrot.slane %v873_v20, 4  ;;  %v894_v38 = vsel %vm872_vm5, %v859_v33, 0.0  ;;  %v826_v27 = vadd.f32 %v1311_v52, %v1690_v51  ;;  %v772_v13 = vpop.f32.mrb[37].mxu0 }
 0x431   :  { %v889_v39 = vadd.f32 %v888_v34, %v887_v50  ;;  %v895_v41 = vrot.slane %v894_v38, 4  ;;  %v880_v22 = vsel %vm872_vm5, %v857_v36, 0.0  ;;  %v824_v43 = vadd.f32 %v772_v13, %v1686_v0  ;;  %v1312_v44 = vpop.f32.mrb[38].mxu0 }
 0x432   :  { %v875_v46 = vadd.f32 %v874_v57, %v873_v20  ;;  %v881_v49 = vrot.slane %v880_v22, 4  ;;  %v846_v35 = vadd.f32 %v1717_v3, %v826_v27  ;;  %v827_v30 = vadd.f32 %v1312_v44, %v1692_v53  ;;  %v775_v54 = vpop.f32.mrb[39].mxu0 }
 0x433   :  { %v890_v56 = vrot.slane %v889_v39, 2  ;;  %v896_v37 = vadd.f32 %v895_v41, %v894_v38  ;;  %v844_v60 = vadd.f32 %v1717_v3, %v824_v43  ;;  %v825_v51 = vadd.f32 %v775_v54, %v1688_v48 }
 0x434   :  { %v876_v32 = vrot.slane %v875_v46, 2  ;;  %v882_v1 = vadd.f32 %v881_v49, %v880_v22  ;;  %v862_v8 = vmax.f32 %v846_v35, 0.0  ;;  %v847_v9 = vadd.f32 %v1717_v3, %v827_v30 }
 0x435   :  { %v891_v0 = vadd.f32 %v890_v56, %v889_v39  ;;  %v897_v11 = vrot.slane %v896_v37, 2  ;;  %v860_v12 = vmax.f32 %v844_v60, 0.0  ;;  %v845_v40 = vadd.f32 %v1717_v3, %v825_v51 }
 0x436   :  { %v877_v15 = vadd.f32 %v876_v32, %v875_v46  ;;  %v883_v17 = vrot.slane %v882_v1, 2  ;;  %v915_v53 = vsel %vm872_vm5, %v862_v8, 0.0  ;;  %v863_v47 = vmax.f32 %v847_v9, 0.0 }
 0x437   :  { %v892_v18 = vrot.slane %v891_v0, 1  ;;  %v898_v19 = vadd.f32 %v897_v11, %v896_v37  ;;  %v916_v42 = vrot.slane %v915_v53, 4  ;;  %v901_v48 = vsel %vm872_vm5, %v860_v12, 0.0  ;;  %v1315_v61 = vpop.f32.mrb[40].mxu0 }
 0x438   :  { %v878_v62 = vrot.slane %v877_v15, 1  ;;  %v884_v4 = vadd.f32 %v883_v17, %v882_v1  ;;  %v902_v5 = vrot.slane %v901_v48, 4  ;;  %v922_v6 = vsel %vm872_vm5, %v863_v47, 0.0  ;;  %v788_v7 = vpop.f32.mrb[41].mxu0 }
 0x439   :  { %v893_v21 = vadd.f32 %v892_v18, %v891_v0  ;;  %v899_v23 = vrot.slane %v898_v19, 1  ;;  %v917_v24 = vadd.f32 %v916_v42, %v915_v53  ;;  %v923_v26 = vrot.slane %v922_v6, 4  ;;  %v1316_v28 = vpop.f32.mrb[42].mxu0 }
 0x43a   :  { %v879_v29 = vadd.f32 %v878_v62, %v877_v15  ;;  %v885_v31 = vrot.slane %v884_v4, 1  ;;  %v903_v55 = vadd.f32 %v902_v5, %v901_v48  ;;  %v861_v25 = vmax.f32 %v845_v40, 0.0  ;;  %v791_v50 = vpop.f32.mrb[43].mxu0 }
 0x43b   :  { %v987_v33 = vpack.c.bf16 %v893_v21, %v893_v21  ;;  %v900_v34 = vadd.f32 %v899_v23, %v898_v19  ;;  %v918_v20 = vrot.slane %v917_v24, 2  ;;  %v924_v36 = vadd.f32 %v923_v26, %v922_v6 }
 0x43c   :  { %v985_v52 = vpack.c.bf16 %v879_v29, %v879_v29  ;;  %v886_v57 = vadd.f32 %v885_v31, %v884_v4  ;;  %v904_v38 = vrot.slane %v903_v55, 2  ;;  %v908_v27 = vsel %vm872_vm5, %v861_v25, 0.0 }
 0x43d   :  { %v1027_v13 = vunpack.c.l.b16 %v987_v33  ;;  %v988_v39 = vpack.c.bf16 %v900_v34, %v900_v34  ;;  %v919_v41 = vadd.f32 %v918_v20, %v917_v24  ;;  %v925_v22 = vrot.slane %v924_v36, 2 }
 0x43e   :  { %v1025_v43 = vunpack.c.l.b16 %v985_v52  ;;  %v986_v44 = vpack.c.bf16 %v886_v57, %v886_v57  ;;  %v905_v46 = vadd.f32 %v904_v38, %v903_v55  ;;  %v909_v49 = vrot.slane %v908_v27, 4 }
 0x43f   :  { %v1028_v35 = vunpack.c.l.b16 %v988_v39  ;;  %v920_v30 = vrot.slane %v919_v41, 1  ;;  %v926_v54 = vadd.f32 %v925_v22, %v924_v36  ;;  %v830_v56 = vadd.f32 %v1315_v61, %v1698_v63  ;;  %v1319_v37 = vpop.f32.mrb[44].mxu0 }
 0x440   :  { %v1026_v60 = vunpack.c.l.b16 %v986_v44  ;;  %v906_v51 = vrot.slane %v905_v46, 1  ;;  %v910_v32 = vadd.f32 %v909_v49, %v908_v27  ;;  %v828_v1 = vadd.f32 %v788_v7, %v1694_v58  ;;  %v804_v8 = vpop.f32.mrb[45].mxu0 }
 0x441   :  { %v921_v9 = vadd.f32 %v920_v30, %v919_v41  ;;  %v927_v0 = vrot.slane %v926_v54, 1  ;;  %v850_v11 = vadd.f32 %v1717_v3, %v830_v56  ;;  %v831_v12 = vadd.f32 %v1316_v28, %v1700_v2  ;;  %v1320_v40 = vpop.f32.mrb[46].mxu0 }
 0x442   :  { %v1042_v15 = vsel %vm1041_vm6, %v1026_v60, %v1025_v43  ;;  %v907_v17 = vadd.f32 %v906_v51, %v905_v46  ;;  %v911_v53 = vrot.slane %v910_v32, 2  ;;  %v848_v63 = vadd.f32 %v1717_v3, %v828_v1  ;;  %v807_v47 = vpop.f32.mrb[47].mxu0 }
 0x443   :  { %v1044_v18 = vsel %vm1043_vm7, %v1027_v13, %v1042_v15  ;;  %v991_v19 = vpack.c.bf16 %v921_v9, %v921_v9  ;;  %v866_v58 = vmax.f32 %v850_v11, 0.0  ;;  %v928_v4 = vadd.f32 %v927_v0, %v926_v54 }
 0x444   :  { %v989_v42 = vpack.c.bf16 %v907_v17, %v907_v17  ;;  %v1046_v48 = vsel %vm1045_vm8, %v1028_v35, %v1044_v18  ;;  %v912_v61 = vadd.f32 %v911_v53, %v910_v32  ;;  %v864_v62 = vmax.f32 %v848_v63, 0.0 }
 0x445   :  { %v943_v2 = vsel %vm872_vm5, %v866_v58, 0.0  ;;  %v851_v5 = vadd.f32 %v1717_v3, %v831_v12  ;;  %v1031_v24 = vunpack.c.l.b16 %v991_v19  ;;  %v829_v29 = vadd.f32 %v791_v50, %v1696_v59 }
 0x446   :  { %v1029_v6 = vunpack.c.l.b16 %v989_v42  ;;  %v913_v7 = vrot.slane %v912_v61, 1  ;;  %v944_v21 = vrot.slane %v943_v2, 4  ;;  %v929_v23 = vsel %vm872_vm5, %v864_v62, 0.0 }
 0x447   :  { %v930_v26 = vrot.slane %v929_v23, 4  ;;  %v867_v28 = vmax.f32 %v851_v5, 0.0  ;;  %v834_v33 = vadd.f32 %v1319_v37, %v1706_v14  ;;  %v849_v36 = vadd.f32 %v1717_v3, %v829_v29 }
 0x448   :  { %v1048_v31 = vsel %vm1047_vm9, %v1029_v6, %v1046_v48  ;;  %v914_v55 = vadd.f32 %v913_v7, %v912_v61  ;;  %v945_v25 = vadd.f32 %v944_v21, %v943_v2  ;;  %v832_v52 = vadd.f32 %v804_v8, %v1702_v10 }
 0x449   :  { %v931_v34 = vadd.f32 %v930_v26, %v929_v23  ;;  %v950_v20 = vsel %vm872_vm5, %v867_v28, 0.0  ;;  %v854_v13 = vadd.f32 %v1717_v3, %v834_v33  ;;  %v865_v59 = vmax.f32 %v849_v36, 0.0 }
 0x44a   :  { %v990_v57 = vpack.c.bf16 %v914_v55, %v914_v55  ;;  %v946_v38 = vrot.slane %v945_v25, 2  ;;  %v951_v27 = vrot.slane %v950_v20, 4  ;;  %v852_v50 = vadd.f32 %v1717_v3, %v832_v52 }
 0x44b   :  { %v932_v39 = vrot.slane %v931_v34, 2  ;;  %v835_v41 = vadd.f32 %v1320_v40, %v1708_v16  ;;  %v870_v44 = vmax.f32 %v854_v13, 0.0  ;;  %v936_v49 = vsel %vm872_vm5, %v865_v59, 0.0 }
 0x44c   :  { %v1030_v22 = vunpack.c.l.b16 %v990_v57  ;;  %v947_v14 = vadd.f32 %v946_v38, %v945_v25  ;;  %v952_v43 = vadd.f32 %v951_v27, %v950_v20  ;;  %v868_v35 = vmax.f32 %v852_v50, 0.0 }
 0x44d   :  { %v933_v46 = vadd.f32 %v932_v39, %v931_v34  ;;  %v855_v10 = vadd.f32 %v1717_v3, %v835_v41  ;;  %v937_v56 = vrot.slane %v936_v49, 4  ;;  %v992_v37 = vpack.c.bf16 %v928_v4, %v928_v4 }
 0x44e   :  { %v1050_v30 = vsel %vm1049_vm10, %v1030_v22, %v1048_v31  ;;  %v953_v54 = vrot.slane %v952_v43, 2  ;;  %v971_v51 = vsel %vm872_vm5, %v870_v44, 0.0  ;;  %v957_v16 = vsel %vm872_vm5, %v868_v35, 0.0 }
 0x44f   :  { %v1052_v60 = vsel %vm1051_vm11, %v1031_v24, %v1050_v30  ;;  %v934_v32 = vrot.slane %v933_v46, 1  ;;  %v938_v8 = vadd.f32 %v937_v56, %v936_v49  ;;  %v972_v9 = vrot.slane %v971_v51, 4 }
 0x450   :  { %v954_v1 = vadd.f32 %v953_v54, %v952_v43  ;;  %v948_v0 = vrot.slane %v947_v14, 1  ;;  %v958_v11 = vrot.slane %v957_v16, 4  ;;  %v871_v12 = vmax.f32 %v855_v10, 0.0 }
 0x451   :  { %v833_v40 = vadd.f32 %v807_v47, %v1704_v45  ;;  %v939_v17 = vrot.slane %v938_v8, 2  ;;  %v973_v53 = vadd.f32 %v972_v9, %v971_v51  ;;  %v1032_v58 = vunpack.c.l.b16 %v992_v37 }
 0x452   :  { %v955_v15 = vrot.slane %v954_v1, 1  ;;  %v959_v63 = vadd.f32 %v958_v11, %v957_v16  ;;  %v978_v18 = vsel %vm872_vm5, %v871_v12, 0.0  ;;  %v935_v42 = vadd.f32 %v934_v32, %v933_v46  ;;  %v1218_v12 = vld [vmem:[#allocation7 + $0x2] ss:$0 sm:$0xff] }
 0x453   :  { %v853_v19 = vadd.f32 %v1717_v3, %v833_v40  ;;  %v940_v48 = vadd.f32 %v939_v17, %v938_v8  ;;  %v974_v61 = vrot.slane %v973_v53, 2  ;;  %v949_v62 = vadd.f32 %v948_v0, %v947_v14 }
 0x454   :  { %v960_v4 = vrot.slane %v959_v63, 2  ;;  %v979_v2 = vrot.slane %v978_v18, 4  ;;  %v956_v6 = vadd.f32 %v955_v15, %v954_v1  ;;  %v1054_v45 = vsel %vm1053_vm12, %v1032_v58, %v1052_v60 }
 0x455   :  { %v869_v5 = vmax.f32 %v853_v19, 0.0  ;;  %v941_v7 = vrot.slane %v940_v48, 1  ;;  %v975_v47 = vadd.f32 %v974_v61, %v973_v53  ;;  %v993_v26 = vpack.c.bf16 %v935_v42, %v935_v42 }
 0x456   :  { %v961_v21 = vadd.f32 %v960_v4, %v959_v63  ;;  %v980_v23 = vadd.f32 %v979_v2, %v978_v18  ;;  %v995_v29 = vpack.c.bf16 %v949_v62, %v949_v62  ;;  %v996_v25 = vpack.c.bf16 %v956_v6, %v956_v6 }
 0x457   :  { %v964_v24 = vsel %vm872_vm5, %v869_v5, 0.0  ;;  %v942_v3 = vadd.f32 %v941_v7, %v940_v48  ;;  %v976_v20 = vrot.slane %v975_v47, 1  ;;  %v1033_v57 = vunpack.c.l.b16 %v993_v26 }
 0x458   :  { %v965_v28 = vrot.slane %v964_v24, 4  ;;  %v962_v31 = vrot.slane %v961_v21, 1  ;;  %v981_v55 = vrot.slane %v980_v23, 2  ;;  %v1035_v13 = vunpack.c.l.b16 %v995_v29 }
 0x459   :  { %v994_v33 = vpack.c.bf16 %v942_v3, %v942_v3  ;;  %v1036_v50 = vunpack.c.l.b16 %v996_v25  ;;  %v977_v43 = vadd.f32 %v976_v20, %v975_v47  ;;  %v1120_v0 = vlaneseq }
 0x45a   :  { %v966_v34 = vadd.f32 %v965_v28, %v964_v24  ;;  %v963_v36 = vadd.f32 %v962_v31, %v961_v21  ;;  %v982_v52 = vadd.f32 %v981_v55, %v980_v23 }
 0x45b   :  { %v1034_v38 = vunpack.c.l.b16 %v994_v33  ;;  %v999_v54 = vpack.c.bf16 %v977_v43, %v977_v43  ;;  %v1121_v11 = vand.u32 127, %v1120_v0 }
 0x45c   :  { %v967_v27 = vrot.slane %v966_v34, 2  ;;  %v997_v39 = vpack.c.bf16 %v963_v36, %v963_v36  ;;  %v983_v59 = vrot.slane %v982_v52, 1 }
 0x45d   :  { %v1055_v41 = vsel %vm1041_vm6, %v1034_v38, %v1033_v57  ;;  %v1039_v51 = vunpack.c.l.b16 %v999_v54  ;;  %vm1122_vm13 = vcmp.lt.s32.totalorder %v1121_v11, 5 }
 0x45e   :  { %v968_v22 = vadd.f32 %v967_v27, %v966_v34  ;;  %v1056_v14 = vsel %vm1043_vm7, %v1035_v13, %v1055_v41  ;;  %v1037_v44 = vunpack.c.l.b16 %v997_v39  ;;  %v984_v49 = vadd.f32 %v983_v59, %v982_v52 }
 0x45f   :  { %v1057_v46 = vsel %vm1045_vm8, %v1036_v50, %v1056_v14 }
 0x460   :  { %v969_v35 = vrot.slane %v968_v22, 1  ;;  %v1058_v10 = vsel %vm1047_vm9, %v1037_v44, %v1057_v46  ;;  %v1000_v56 = vpack.c.bf16 %v984_v49, %v984_v49 }
 0x462   :  { %v970_v30 = vadd.f32 %v969_v35, %v968_v22  ;;  %v1040_v16 = vunpack.c.l.b16 %v1000_v56 }
 0x464   :  { %v998_v37 = vpack.c.bf16 %v970_v30, %v970_v30 }
 0x466   :  { %v1038_v60 = vunpack.c.l.b16 %v998_v37 }
 0x468   :  { %v1059_v32 = vsel %vm1049_vm10, %v1038_v60, %v1058_v10 }
 0x469   :  { %v1060_v1 = vsel %vm1051_vm11, %v1039_v51, %v1059_v32 }
 0x46a   :  { %v1061_v8 = vsel %vm1053_vm12, %v1040_v16, %v1060_v1 }
 0x46b   :  { %v1062_v9 = vpack.c.b16 %v1061_v8, %v1054_v45 }
 0x46d   :  { %1326 = vmatmul.mubr.msk.bf16.vlgmr.msra.gmra.mrb[48].mxu0 %vm872_vm5, %v1062_v9 }
 0x540   :  { %v1113_v40 = vpop.f32.mrb[48].mxu0 }
 0x541   :  { %v1114_v15 = vadd.f32 %v1218_v12, %v1113_v40  ;;  %v1327_v17 = vpop.f32.mrb[49].mxu0 }
 0x542   :  { %v1116_v53 = vpop.f32.mrb[50].mxu0 }
 0x543   :  { %v1117_v63 = vadd.f32 %v1218_v12, %v1116_v53  ;;  %v1328_v18 = vpop.f32.mrb[51].mxu0  ;;  %v1123_v19 = vsel %vm1122_vm13, %v1114_v15, -1e+30 }
 0x544   :  { %1125 = vmax.xlane.f32.xlu0 %v1123_v19 }
 0x545   :  { %v1124_v58 = vsel %vm1122_vm13, %v1117_v63, -1e+30 }
 0x548   :  { %1127 = vmax.xlane.f32.xlu0 %v1124_v58 }
 0x5d1   :  { %v1126_v42 = vpop.xlane.xlu0 %1125 }
 0x5d2   :  { %v1129_v48 = vsub.f32 %v1114_v15, %v1126_v42 }
 0x5d4   :  { %v1131_v61 = vmul.f32 1.442695, %v1129_v48 }
 0x5d5   :  { %v1128_v62 = vpop.xlane.xlu0 %1127 }
 0x5d6   :  { %1379 = vpow2.f32 %v1131_v61  ;;  %v1130_v4 = vsub.f32 %v1117_v63, %v1128_v62 }
 0x5d8   :  { %v1133_v2 = vmul.f32 1.442695, %v1130_v4 }
 0x5da   :  { %1381 = vpow2.f32 %v1133_v2 }
 0x5e0   :  { %v1380_v5 = vpop.eup %1379 }
 0x5e1   :  { %v1135_v6 = vsel %vm1122_vm13, %v1380_v5, 0.0 }
 0x5e2   :  { %1137 = vadd.xlane.f32.xlu1 %v1135_v6 }
 0x5e4   :  { %v1382_v7 = vpop.eup %1381 }
 0x5e5   :  { %v1136_v45 = vsel %vm1122_vm13, %v1382_v7, 0.0 }
 0x5e6   :  { %1139 = vadd.xlane.f32.xlu1 %v1136_v45 }
 0x66f   :  { %v1138_v47 = vpop.xlane.xlu1 %1137 }
 0x670   :  { %1383 = vlog2.f32 %v1138_v47 }
 0x673   :  { %v1140_v21 = vpop.xlane.xlu1 %1139 }
 0x674   :  { %1385 = vlog2.f32 %v1140_v21 }
 0x67a   :  { %v1384_v23 = vpop.eup %1383 }
 0x67b   :  { %v1142_v24 = vmul.f32 0.6931472, %v1384_v23 }
 0x67d   :  { %v1145_v26 = vsub.f32 %v1129_v48, %v1142_v24 }
 0x67e   :  { %v1386_v3 = vpop.eup %1385 }
 0x67f   :  { %1147 = vst [vmem:[#allocation8] sm:$0xff] %v1145_v26  ;;  %v1144_v28 = vmul.f32 0.6931472, %v1386_v3 }
 0x681   :  { %v1146_v29 = vsub.f32 %v1130_v4, %v1144_v28 }
 0x683   :  { %1148 = vst [vmem:[#allocation8 + $0x8] sm:$0xff] %v1146_v29 }
 0x684   :  { %1464 = shalt.err (!%p1461_p0)
}
 0x685   :  { %s1465_s27 = scalar_lea.hbm %s1804_s3, 256 }
 0x686   :  { %p1466_p1 = scmp.ne.s32.totalorder %s1804_s3, %s1465_s27  ;;  %p1469_p2 = scmp.lt.u32.totalorder %s1465_s27, %s1804_s3 }
 0x688   :  { %p1471_p3 = pnand %p1469_p2, %p1466_p1 }
 0x68a   :  { %1474 = shalt.err (!%p1471_p3)
}
 0x68b   :  { %1160 = dma.vmem_to_hbm [thread:$0]  %s1155_s21, 256, %s1804_s3, [#allocation4], %s1483_s24, %s1483_s24, %s1484_s25  }
 0x68c   :  { %1479 = dma.done.wait [#allocation4], 256  }
 0x68d   :  { %1480 = vsyncadd [#allocation4], 4294967040 }
 0x68e   :  { %1164 = vsyncpa [#allocation3], 1 }
 0x68f   :  { %1165 = vsyncpa [#allocation6], 1 }
 0x690   :  { %1166 = vsyncpa [#allocation4], 1 }

</bundles_post_ra>
